<compile_context>
chip_gen: v7x
topology: tpu7x:2x2x1
jax: 0.10.0
libtpu: 0.0.40
codegen_flags: <defaults>
</compile_context>

<pallas_src>
import functools

import jax
import jax.numpy as jnp
from jax.experimental import pallas as pl
from jax.experimental.pallas import tpu as pltpu

LN_EPS = 1e-5  # torch.nn.LayerNorm default


def _round_up(x, m):
    return ((x + m - 1) // m) * m


def _mlp_fused_kernel(x_ref, w_ref, b_ref, o_ref, *, d_ins):
    # x_ref: (tile_b, Dp)      padded activations (padded lanes are exactly zero)
    # w_ref: (L, Dp, Dp)       padded weights, stored in the MXU compute dtype
    # b_ref: (L, 1, Dp)        padded biases (f32)
    # o_ref: (tile_b, Dp)
    h = x_ref[...].astype(jnp.float32)
    lane = jax.lax.broadcasted_iota(jnp.int32, h.shape, 1)

    for l, d_in in enumerate(d_ins):            # static unrolled loop over layers
        inv_n = jnp.float32(1.0 / d_in)
        # Padded lanes of h are zero, so the full-row sum equals the sum over valid lanes.
        mean = jnp.sum(h, axis=-1, keepdims=True) * inv_n
        xc = jnp.where(lane < d_in, h - mean, 0.0)          # re-zero padded lanes
        var = jnp.sum(xc * xc, axis=-1, keepdims=True) * inv_n   # biased var (torch LN)
        xn = xc * jax.lax.rsqrt(var + LN_EPS)                # no elementwise affine
        a = jnp.maximum(xn, 0.0)                             # ReLU (padded lanes stay 0)
        w = w_ref[l]                                         # (Dp, Dp), already compute dtype
        h = jnp.dot(a.astype(w.dtype), w,
                    preferred_element_type=jnp.float32) + b_ref[l]
        # Padded output lanes: zero weight cols + zero bias -> stay exactly zero.

    o_ref[...] = h.astype(o_ref.dtype)


def pack_mlp_params(params, *, mxu_dtype=jnp.float32):
    """Zero-pad every layer's (W, b) to a common lane-dense width and stack them."""
    layer_sizes = [params[0][0].shape[0]] + [w.shape[1] for w, _ in params]
    Dp = max(_round_up(d, 128) for d in layer_sizes)
    L = len(params)
    w_stack = jnp.zeros((L, Dp, Dp), mxu_dtype)
    b_stack = jnp.zeros((L, 1, Dp), jnp.float32)
    for l, (w, b) in enumerate(params):
        d_in, d_out = w.shape
        w_stack = w_stack.at[l, :d_in, :d_out].set(w.astype(mxu_dtype))
        b_stack = b_stack.at[l, 0, :d_out].set(b.astype(jnp.float32))
    return w_stack, b_stack, layer_sizes


def mlp_pallas(x, w_stack, b_stack, layer_sizes, *,
               tile_b=256, single_buffer_weights=True):
    """Fused multi-layer (LayerNorm -> ReLU -> Linear)^L forward in one pallas_call."""
    B, d0 = x.shape
    assert d0 == layer_sizes[0]
    L, Dp, _ = w_stack.shape
    d_ins = tuple(layer_sizes[:-1])
    d_out = layer_sizes[-1]

    # Batch tiling: multiple of 8 sublanes, large tiles, balanced so padding waste is
    # small and (when enough work exists) the parallel grid has >=2 steps for v7x's 2 TCs.
    b_rounded = _round_up(max(B, 1), 8)
    tb = min(tile_b, b_rounded)
    num_tiles = pl.cdiv(b_rounded, tb)
    if num_tiles == 1 and b_rounded >= 256:
        num_tiles = 2
    tb = _round_up(pl.cdiv(b_rounded, num_tiles), 8)
    Bp = num_tiles * tb

    x_pad = jnp.pad(x, ((0, Bp - B), (0, Dp - d0)))

    wb_kwargs = {"pipeline_mode": pl.Buffered(1)} if single_buffer_weights else {}

    itemsize = lambda a: a.dtype.itemsize
    cost = pl.CostEstimate(
        flops=2 * Bp * L * Dp * Dp,
        transcendentals=Bp * L,  # one rsqrt per row per layer
        bytes_accessed=(x_pad.size * itemsize(x_pad)
                        + w_stack.size * itemsize(w_stack)
                        + b_stack.size * itemsize(b_stack)
                        + Bp * Dp * itemsize(x_pad)),
    )

    out_pad = pl.pallas_call(
        functools.partial(_mlp_fused_kernel, d_ins=d_ins),
        out_shape=jax.ShapeDtypeStruct((Bp, Dp), x.dtype),
        grid_spec=pltpu.PrefetchScalarGridSpec(
            num_scalar_prefetch=0,
            grid=(num_tiles,),
            in_specs=[
                pl.BlockSpec((tb, Dp), lambda i: (i, 0)),                   # activations
                pl.BlockSpec((L, Dp, Dp), lambda i: (0, 0, 0), **wb_kwargs),  # all weights
                pl.BlockSpec((L, 1, Dp), lambda i: (0, 0, 0), **wb_kwargs),   # all biases
            ],
            out_specs=pl.BlockSpec((tb, Dp), lambda i: (i, 0)),
        ),
        compiler_params=pltpu.CompilerParams(
            dimension_semantics=("parallel",),
            vmem_limit_bytes=32 * 1024 * 1024,
        ),
        cost_estimate=cost,
    )(x_pad, w_stack, b_stack)

    return out_pad[:B, :d_out]


def init_mlp_params(key, layer_sizes):
    """Deterministic params matching nn.Linear(in, out) shapes for each layer."""
    params = []
    for i, (d_in, d_out) in enumerate(zip(layer_sizes[:-1], layer_sizes[1:])):
        kw, kb = jax.random.split(jax.random.fold_in(key, i))
        bound = 1.0 / (d_in ** 0.5)
        # stored as (d_in, d_out) so the kernel does x @ W (equivalent to torch x @ W_t.T)
        w = jax.random.uniform(kw, (d_in, d_out), jnp.float32, -bound, bound)
        b = jax.random.uniform(kb, (d_out,), jnp.float32, -bound, bound)
        params.append((w, b))
    return params


def mlp_reference(x, params):
    # pure-JAX reference of the same forward (LayerNorm no-affine -> ReLU -> Linear), f32
    for w, b in params:
        mean = jnp.mean(x, axis=-1, keepdims=True)
        xc = x - mean
        var = jnp.mean(xc * xc, axis=-1, keepdims=True)
        xn = xc * jax.lax.rsqrt(var + LN_EPS)
        x = jnp.maximum(xn, 0.0) @ w + b
    return x


if __name__ == "__main__":
    key = jax.random.PRNGKey(0)
    layer_sizes = [32, 64, 32]
    batch = 8

    kx, kp = jax.random.split(key)
    x = jax.random.normal(kx, (batch, layer_sizes[0]), jnp.float32)
    params = init_mlp_params(kp, layer_sizes)

    ref = mlp_reference(x, params)

    def run(mxu_dtype):
        w_stack, b_stack, sizes = pack_mlp_params(params, mxu_dtype=mxu_dtype)
        try:
            out = mlp_pallas(x, w_stack, b_stack, sizes, single_buffer_weights=True)
        except Exception:
            # Fallback if pipeline_mode=pl.Buffered(1) is unsupported in this jax build.
            out = mlp_pallas(x, w_stack, b_stack, sizes, single_buffer_weights=False)
        return jax.block_until_ready(out)

    # f32 MXU operands: bit-for-bit the torch-semantics math.
    out_f32 = run(jnp.float32)
    assert out_f32.shape == (batch, layer_sizes[-1])
    assert jnp.allclose(out_f32, ref, atol=1e-4, rtol=1e-4), "f32 kernel mismatch vs reference"

    # bf16 MXU operands (fast path on v6e/v7x), f32 accumulation + f32 LayerNorm math.
    out_bf16 = run(jnp.bfloat16)
    assert out_bf16.shape == (batch, layer_sizes[-1])
    assert jnp.allclose(out_bf16, ref, atol=5e-2, rtol=5e-2), "bf16 kernel mismatch vs reference"

    print("KERNEL_OK")
</pallas_src>

<mosaic_0001>
module attributes {stable_mosaic.version = 11 : i64} {
  func.func @_mlp_fused_kernel(%arg0: i32, %arg1: memref<8x128xf32, #tpu.memory_space<vmem>>, %arg2: memref<2x128x128xf32, #tpu.memory_space<vmem>>, %arg3: memref<2x1x128xf32, #tpu.memory_space<vmem>>, %arg4: memref<8x128xf32, #tpu.memory_space<vmem>>) attributes {dimension_semantics = [#tpu.dimension_semantics<parallel>], iteration_bounds = array<i64: 1>, scalar_prefetch = 0 : i64, scratch_operands = 0 : i64, tpu.core_type = #tpu.core_type<tc>, window_params = [{transform_indices = @transform_0, window_bounds = array<i64: 8, 128>}, {pipeline_mode = #tpu.pipeline_mode<synchronous>, transform_indices = @transform_1, window_bounds = array<i64: 2, 128, 128>}, {pipeline_mode = #tpu.pipeline_mode<synchronous>, transform_indices = @transform_2, window_bounds = array<i64: 2, 1, 128>}, {transform_indices = @transform_3, window_bounds = array<i64: 8, 128>}]} {
    %c0 = arith.constant 0 : index
    %c0_0 = arith.constant 0 : index
    %0 = vector.load %arg1[%c0, %c0_0] : memref<8x128xf32, #tpu.memory_space<vmem>>, vector<8x128xf32>
    %1 = tpu.iota {dimensions = array<i32: 1>} : vector<8x128xi32>
    %cst = arith.constant dense<0.000000e+00> : vector<8xf32>
    %2 = vector.multi_reduction <add>, %0, %cst [1] : vector<8x128xf32> to vector<8xf32>
    %3 = vector.shape_cast %2 : vector<8xf32> to vector<8x1xf32>
    %cst_1 = arith.constant 3.125000e-02 : f32
    %4 = vector.broadcast %cst_1 : f32 to vector<8x1xf32>
    %5 = arith.mulf %3, %4 : vector<8x1xf32>
    %c32_i32 = arith.constant 32 : i32
    %6 = vector.broadcast %c32_i32 : i32 to vector<8x128xi32>
    %7 = arith.cmpi slt, %1, %6 : vector<8x128xi32>
    %8 = vector.broadcast %5 : vector<8x1xf32> to vector<8x128xf32>
    %9 = arith.subf %0, %8 : vector<8x128xf32>
    %cst_2 = arith.constant 0.000000e+00 : f32
    %10 = vector.broadcast %cst_2 : f32 to vector<8x128xf32>
    %11 = arith.select %7, %9, %10 : vector<8x128xi1>, vector<8x128xf32>
    %12 = arith.mulf %11, %11 : vector<8x128xf32>
    %cst_3 = arith.constant dense<0.000000e+00> : vector<8xf32>
    %13 = vector.multi_reduction <add>, %12, %cst_3 [1] : vector<8x128xf32> to vector<8xf32>
    %14 = vector.shape_cast %13 : vector<8xf32> to vector<8x1xf32>
    %cst_4 = arith.constant 3.125000e-02 : f32
    %15 = vector.broadcast %cst_4 : f32 to vector<8x1xf32>
    %16 = arith.mulf %14, %15 : vector<8x1xf32>
    %cst_5 = arith.constant 9.99999974E-6 : f32
    %17 = vector.broadcast %cst_5 : f32 to vector<8x1xf32>
    %18 = arith.addf %16, %17 : vector<8x1xf32>
    %19 = math.rsqrt %18 : vector<8x1xf32>
    %20 = vector.broadcast %19 : vector<8x1xf32> to vector<8x128xf32>
    %21 = arith.mulf %11, %20 : vector<8x128xf32>
    %cst_6 = arith.constant 0.000000e+00 : f32
    %22 = vector.broadcast %cst_6 : f32 to vector<8x128xf32>
    %23 = arith.maximumf %21, %22 : vector<8x128xf32>
    %c0_7 = arith.constant 0 : index
    %c0_8 = arith.constant 0 : index
    %c0_9 = arith.constant 0 : index
    %24 = vector.load %arg2[%c0_7, %c0_8, %c0_9] : memref<2x128x128xf32, #tpu.memory_space<vmem>>, vector<1x128x128xf32>
    %25 = vector.shape_cast %24 : vector<1x128x128xf32> to vector<128x128xf32>
    %cst_10 = arith.constant dense<0.000000e+00> : vector<8x128xf32>
    %26 = tpu.matmul %23, %25, %cst_10 {dimension_numbers = #tpu.dot_dimension_numbers<[1], [0], [0], [1], [0, 0, 1, 1], [], []>} : vector<8x128xf32>, vector<128x128xf32>, vector<8x128xf32> -> vector<8x128xf32>
    %c0_11 = arith.constant 0 : index
    %c0_12 = arith.constant 0 : index
    %c0_13 = arith.constant 0 : index
    %27 = vector.load %arg3[%c0_11, %c0_12, %c0_13] : memref<2x1x128xf32, #tpu.memory_space<vmem>>, vector<1x1x128xf32>
    %28 = vector.shape_cast %27 : vector<1x1x128xf32> to vector<1x128xf32>
    %29 = vector.broadcast %28 : vector<1x128xf32> to vector<8x128xf32>
    %30 = arith.addf %26, %29 : vector<8x128xf32>
    %cst_14 = arith.constant dense<0.000000e+00> : vector<8xf32>
    %31 = vector.multi_reduction <add>, %30, %cst_14 [1] : vector<8x128xf32> to vector<8xf32>
    %32 = vector.shape_cast %31 : vector<8xf32> to vector<8x1xf32>
    %cst_15 = arith.constant 1.562500e-02 : f32
    %33 = vector.broadcast %cst_15 : f32 to vector<8x1xf32>
    %34 = arith.mulf %32, %33 : vector<8x1xf32>
    %c64_i32 = arith.constant 64 : i32
    %35 = vector.broadcast %c64_i32 : i32 to vector<8x128xi32>
    %36 = arith.cmpi slt, %1, %35 : vector<8x128xi32>
    %37 = vector.broadcast %34 : vector<8x1xf32> to vector<8x128xf32>
    %38 = arith.subf %30, %37 : vector<8x128xf32>
    %cst_16 = arith.constant 0.000000e+00 : f32
    %39 = vector.broadcast %cst_16 : f32 to vector<8x128xf32>
    %40 = arith.select %36, %38, %39 : vector<8x128xi1>, vector<8x128xf32>
    %41 = arith.mulf %40, %40 : vector<8x128xf32>
    %cst_17 = arith.constant dense<0.000000e+00> : vector<8xf32>
    %42 = vector.multi_reduction <add>, %41, %cst_17 [1] : vector<8x128xf32> to vector<8xf32>
    %43 = vector.shape_cast %42 : vector<8xf32> to vector<8x1xf32>
    %cst_18 = arith.constant 1.562500e-02 : f32
    %44 = vector.broadcast %cst_18 : f32 to vector<8x1xf32>
    %45 = arith.mulf %43, %44 : vector<8x1xf32>
    %cst_19 = arith.constant 9.99999974E-6 : f32
    %46 = vector.broadcast %cst_19 : f32 to vector<8x1xf32>
    %47 = arith.addf %45, %46 : vector<8x1xf32>
    %48 = math.rsqrt %47 : vector<8x1xf32>
    %49 = vector.broadcast %48 : vector<8x1xf32> to vector<8x128xf32>
    %50 = arith.mulf %40, %49 : vector<8x128xf32>
    %cst_20 = arith.constant 0.000000e+00 : f32
    %51 = vector.broadcast %cst_20 : f32 to vector<8x128xf32>
    %52 = arith.maximumf %50, %51 : vector<8x128xf32>
    %c1 = arith.constant 1 : index
    %c0_21 = arith.constant 0 : index
    %c0_22 = arith.constant 0 : index
    %53 = vector.load %arg2[%c1, %c0_21, %c0_22] : memref<2x128x128xf32, #tpu.memory_space<vmem>>, vector<1x128x128xf32>
    %54 = vector.shape_cast %53 : vector<1x128x128xf32> to vector<128x128xf32>
    %cst_23 = arith.constant dense<0.000000e+00> : vector<8x128xf32>
    %55 = tpu.matmul %52, %54, %cst_23 {dimension_numbers = #tpu.dot_dimension_numbers<[1], [0], [0], [1], [0, 0, 1, 1], [], []>} : vector<8x128xf32>, vector<128x128xf32>, vector<8x128xf32> -> vector<8x128xf32>
    %c1_24 = arith.constant 1 : index
    %c0_25 = arith.constant 0 : index
    %c0_26 = arith.constant 0 : index
    %56 = vector.load %arg3[%c1_24, %c0_25, %c0_26] : memref<2x1x128xf32, #tpu.memory_space<vmem>>, vector<1x1x128xf32>
    %57 = vector.shape_cast %56 : vector<1x1x128xf32> to vector<1x128xf32>
    %58 = vector.broadcast %57 : vector<1x128xf32> to vector<8x128xf32>
    %59 = arith.addf %55, %58 : vector<8x128xf32>
    %c0_27 = arith.constant 0 : index
    %c0_28 = arith.constant 0 : index
    %60 = vector.load %arg4[%c0_27, %c0_28] : memref<8x128xf32, #tpu.memory_space<vmem>>, vector<8x128xf32>
    tpu.vector_store %arg4[%c0_27, %c0_28], %59 {strides = array<i32>} : memref<8x128xf32, #tpu.memory_space<vmem>>, vector<8x128xf32>,
    return
  }
  func.func @transform_0(%arg0: i32) -> (i32, i32) {
    %c0_i32 = arith.constant 0 : i32
    %c0_i32_0 = arith.constant 0 : i32
    return %arg0, %c0_i32 : i32, i32
  }
  func.func @transform_1(%arg0: i32) -> (i32, i32, i32) {
    %c0_i32 = arith.constant 0 : i32
    %c0_i32_0 = arith.constant 0 : i32
    %c0_i32_1 = arith.constant 0 : i32
    %c0_i32_2 = arith.constant 0 : i32
    return %c0_i32, %c0_i32_0, %c0_i32_1 : i32, i32, i32
  }
  func.func @transform_2(%arg0: i32) -> (i32, i32, i32) {
    %c0_i32 = arith.constant 0 : i32
    %c0_i32_0 = arith.constant 0 : i32
    %c0_i32_1 = arith.constant 0 : i32
    %c0_i32_2 = arith.constant 0 : i32
    return %c0_i32, %c0_i32_0, %c0_i32_1 : i32, i32, i32
  }
  func.func @transform_3(%arg0: i32) -> (i32, i32) {
    %c0_i32 = arith.constant 0 : i32
    %c0_i32_0 = arith.constant 0 : i32
    return %arg0, %c0_i32 : i32, i32
  }
}

module attributes {stable_mosaic.version = 11 : i64} {
  func.func @_mlp_fused_kernel(%arg0: i32, %arg1: memref<8x128xf32, #tpu.memory_space<vmem>>, %arg2: memref<2x128x128xf32, #tpu.memory_space<vmem>>, %arg3: memref<2x1x128xf32, #tpu.memory_space<vmem>>, %arg4: memref<8x128xf32, #tpu.memory_space<vmem>>) attributes {dimension_semantics = [#tpu.dimension_semantics<parallel>], iteration_bounds = array<i64: 1>, scalar_prefetch = 0 : i64, scratch_operands = 0 : i64, tpu.core_type = #tpu.core_type<tc>, window_params = [{transform_indices = @transform_0, window_bounds = array<i64: 8, 128>}, {pipeline_mode = #tpu.pipeline_mode<synchronous>, transform_indices = @transform_1, window_bounds = array<i64: 2, 128, 128>}, {pipeline_mode = #tpu.pipeline_mode<synchronous>, transform_indices = @transform_2, window_bounds = array<i64: 2, 1, 128>}, {transform_indices = @transform_3, window_bounds = array<i64: 8, 128>}]} {
    %c0 = arith.constant 0 : index
    %c0_0 = arith.constant 0 : index
    %0 = vector.load %arg1[%c0, %c0_0] : memref<8x128xf32, #tpu.memory_space<vmem>>, vector<8x128xf32>
    %1 = tpu.iota {dimensions = array<i32: 1>} : vector<8x128xi32>
    %cst = arith.constant dense<0.000000e+00> : vector<8xf32>
    %2 = vector.multi_reduction <add>, %0, %cst [1] : vector<8x128xf32> to vector<8xf32>
    %3 = vector.shape_cast %2 : vector<8xf32> to vector<8x1xf32>
    %cst_1 = arith.constant 3.125000e-02 : f32
    %4 = vector.broadcast %cst_1 : f32 to vector<8x1xf32>
    %5 = arith.mulf %3, %4 : vector<8x1xf32>
    %c32_i32 = arith.constant 32 : i32
    %6 = vector.broadcast %c32_i32 : i32 to vector<8x128xi32>
    %7 = arith.cmpi slt, %1, %6 : vector<8x128xi32>
    %8 = vector.broadcast %5 : vector<8x1xf32> to vector<8x128xf32>
    %9 = arith.subf %0, %8 : vector<8x128xf32>
    %cst_2 = arith.constant 0.000000e+00 : f32
    %10 = vector.broadcast %cst_2 : f32 to vector<8x128xf32>
    %11 = arith.select %7, %9, %10 : vector<8x128xi1>, vector<8x128xf32>
    %12 = arith.mulf %11, %11 : vector<8x128xf32>
    %cst_3 = arith.constant dense<0.000000e+00> : vector<8xf32>
    %13 = vector.multi_reduction <add>, %12, %cst_3 [1] : vector<8x128xf32> to vector<8xf32>
    %14 = vector.shape_cast %13 : vector<8xf32> to vector<8x1xf32>
    %cst_4 = arith.constant 3.125000e-02 : f32
    %15 = vector.broadcast %cst_4 : f32 to vector<8x1xf32>
    %16 = arith.mulf %14, %15 : vector<8x1xf32>
    %cst_5 = arith.constant 9.99999974E-6 : f32
    %17 = vector.broadcast %cst_5 : f32 to vector<8x1xf32>
    %18 = arith.addf %16, %17 : vector<8x1xf32>
    %19 = math.rsqrt %18 : vector<8x1xf32>
    %20 = vector.broadcast %19 : vector<8x1xf32> to vector<8x128xf32>
    %21 = arith.mulf %11, %20 : vector<8x128xf32>
    %cst_6 = arith.constant 0.000000e+00 : f32
    %22 = vector.broadcast %cst_6 : f32 to vector<8x128xf32>
    %23 = arith.maximumf %21, %22 : vector<8x128xf32>
    %c0_7 = arith.constant 0 : index
    %c0_8 = arith.constant 0 : index
    %c0_9 = arith.constant 0 : index
    %24 = vector.load %arg2[%c0_7, %c0_8, %c0_9] : memref<2x128x128xf32, #tpu.memory_space<vmem>>, vector<1x128x128xf32>
    %25 = vector.shape_cast %24 : vector<1x128x128xf32> to vector<128x128xf32>
    %cst_10 = arith.constant dense<0.000000e+00> : vector<8x128xf32>
    %26 = tpu.matmul %23, %25, %cst_10 {dimension_numbers = #tpu.dot_dimension_numbers<[1], [0], [0], [1], [0, 0, 1, 1], [], []>} : vector<8x128xf32>, vector<128x128xf32>, vector<8x128xf32> -> vector<8x128xf32>
    %c0_11 = arith.constant 0 : index
    %c0_12 = arith.constant 0 : index
    %c0_13 = arith.constant 0 : index
    %27 = vector.load %arg3[%c0_11, %c0_12, %c0_13] : memref<2x1x128xf32, #tpu.memory_space<vmem>>, vector<1x1x128xf32>
    %28 = vector.shape_cast %27 : vector<1x1x128xf32> to vector<1x128xf32>
    %29 = vector.broadcast %28 : vector<1x128xf32> to vector<8x128xf32>
    %30 = arith.addf %26, %29 : vector<8x128xf32>
    %cst_14 = arith.constant dense<0.000000e+00> : vector<8xf32>
    %31 = vector.multi_reduction <add>, %30, %cst_14 [1] : vector<8x128xf32> to vector<8xf32>
    %32 = vector.shape_cast %31 : vector<8xf32> to vector<8x1xf32>
    %cst_15 = arith.constant 1.562500e-02 : f32
    %33 = vector.broadcast %cst_15 : f32 to vector<8x1xf32>
    %34 = arith.mulf %32, %33 : vector<8x1xf32>
    %c64_i32 = arith.constant 64 : i32
    %35 = vector.broadcast %c64_i32 : i32 to vector<8x128xi32>
    %36 = arith.cmpi slt, %1, %35 : vector<8x128xi32>
    %37 = vector.broadcast %34 : vector<8x1xf32> to vector<8x128xf32>
    %38 = arith.subf %30, %37 : vector<8x128xf32>
    %cst_16 = arith.constant 0.000000e+00 : f32
    %39 = vector.broadcast %cst_16 : f32 to vector<8x128xf32>
    %40 = arith.select %36, %38, %39 : vector<8x128xi1>, vector<8x128xf32>
    %41 = arith.mulf %40, %40 : vector<8x128xf32>
    %cst_17 = arith.constant dense<0.000000e+00> : vector<8xf32>
    %42 = vector.multi_reduction <add>, %41, %cst_17 [1] : vector<8x128xf32> to vector<8xf32>
    %43 = vector.shape_cast %42 : vector<8xf32> to vector<8x1xf32>
    %cst_18 = arith.constant 1.562500e-02 : f32
    %44 = vector.broadcast %cst_18 : f32 to vector<8x1xf32>
    %45 = arith.mulf %43, %44 : vector<8x1xf32>
    %cst_19 = arith.constant 9.99999974E-6 : f32
    %46 = vector.broadcast %cst_19 : f32 to vector<8x1xf32>
    %47 = arith.addf %45, %46 : vector<8x1xf32>
    %48 = math.rsqrt %47 : vector<8x1xf32>
    %49 = vector.broadcast %48 : vector<8x1xf32> to vector<8x128xf32>
    %50 = arith.mulf %40, %49 : vector<8x128xf32>
    %cst_20 = arith.constant 0.000000e+00 : f32
    %51 = vector.broadcast %cst_20 : f32 to vector<8x128xf32>
    %52 = arith.maximumf %50, %51 : vector<8x128xf32>
    %c1 = arith.constant 1 : index
    %c0_21 = arith.constant 0 : index
    %c0_22 = arith.constant 0 : index
    %53 = vector.load %arg2[%c1, %c0_21, %c0_22] : memref<2x128x128xf32, #tpu.memory_space<vmem>>, vector<1x128x128xf32>
    %54 = vector.shape_cast %53 : vector<1x128x128xf32> to vector<128x128xf32>
    %cst_23 = arith.constant dense<0.000000e+00> : vector<8x128xf32>
    %55 = tpu.matmul %52, %54, %cst_23 {dimension_numbers = #tpu.dot_dimension_numbers<[1], [0], [0], [1], [0, 0, 1, 1], [], []>} : vector<8x128xf32>, vector<128x128xf32>, vector<8x128xf32> -> vector<8x128xf32>
    %c1_24 = arith.constant 1 : index
    %c0_25 = arith.constant 0 : index
    %c0_26 = arith.constant 0 : index
    %56 = vector.load %arg3[%c1_24, %c0_25, %c0_26] : memref<2x1x128xf32, #tpu.memory_space<vmem>>, vector<1x1x128xf32>
    %57 = vector.shape_cast %56 : vector<1x1x128xf32> to vector<1x128xf32>
    %58 = vector.broadcast %57 : vector<1x128xf32> to vector<8x128xf32>
    %59 = arith.addf %55, %58 : vector<8x128xf32>
    %c0_27 = arith.constant 0 : index
    %c0_28 = arith.constant 0 : index
    %60 = vector.load %arg4[%c0_27, %c0_28] : memref<8x128xf32, #tpu.memory_space<vmem>>, vector<8x128xf32>
    tpu.vector_store %arg4[%c0_27, %c0_28], %59 {strides = array<i32>} : memref<8x128xf32, #tpu.memory_space<vmem>>, vector<8x128xf32>,
    return
  }
  func.func @transform_0(%arg0: i32) -> (i32, i32) {
    %c0_i32 = arith.constant 0 : i32
    %c0_i32_0 = arith.constant 0 : i32
    return %arg0, %c0_i32 : i32, i32
  }
  func.func @transform_1(%arg0: i32) -> (i32, i32, i32) {
    %c0_i32 = arith.constant 0 : i32
    %c0_i32_0 = arith.constant 0 : i32
    %c0_i32_1 = arith.constant 0 : i32
    %c0_i32_2 = arith.constant 0 : i32
    return %c0_i32, %c0_i32_0, %c0_i32_1 : i32, i32, i32
  }
  func.func @transform_2(%arg0: i32) -> (i32, i32, i32) {
    %c0_i32 = arith.constant 0 : i32
    %c0_i32_0 = arith.constant 0 : i32
    %c0_i32_1 = arith.constant 0 : i32
    %c0_i32_2 = arith.constant 0 : i32
    return %c0_i32, %c0_i32_0, %c0_i32_1 : i32, i32, i32
  }
  func.func @transform_3(%arg0: i32) -> (i32, i32) {
    %c0_i32 = arith.constant 0 : i32
    %c0_i32_0 = arith.constant 0 : i32
    return %arg0, %c0_i32 : i32, i32
  }
}

</mosaic_0001>

<bundles_post_ra>
// kernel: tpu_custom_call.1
= control target key start
LH: loop header
LB: loop body
LE: loop exit
PB: predicated region body
PF: predicated region fallthrough
CT: control target
= control target key end

     0   :  { %8 = vsyncpa [#allocation3], 0  ;;  %s613_s0 = inlined_call_operand.hbm [shape: f32[8,128], index: 0, kind: input, shape index: {}]   ;;  %s614_s1 = inlined_call_operand.hbm [shape: f32[2,128,128], index: 1, kind: input, shape index: {}]   ;;  %s615_s2 = inlined_call_operand.vmem [shape: f32[2,1,128], index: 2, kind: input, shape index: {}]   ;;  %s616_s3 = inlined_call_operand.hbm [shape: f32[8,128], index: 3, kind: output, shape index: {}]  }
   0x1   :  { %9 = vsyncpa [#allocation6], 0 }
   0x2   :  { %10 = vsyncpa [#allocation4], 0  ;;  %s516_s12 = smov [#allocation2]   ;;  %s517_s14 = smov [#allocation5]  }
   0x3   :  { %s17_s13 = sshll.u32 %s516_s12, 4  ;;  %s26_s15 = sshll.u32 %s517_s14, 4  ;;  %s18_s13 = int_to_ptr.vmem [resolvable:$true] %s17_s13  ;;  %s544_s15 = int_to_ptr.vmem [resolvable:$true] %s26_s15 }
   0x4   :  { %s444_s18 = scalar_lea.hbm %s613_s0, 128 }
   0x5   :  { %p445_p0 = scmp.ne.s32.totalorder %s613_s0, %s444_s18  ;;  %p448_p1 = scmp.lt.u32.totalorder %s444_s18, %s613_s0 }
   0x7   :  { %p450_p2 = pnand %p448_p1, %p445_p0 }
   0x9   :  { %453 = shalt.err (!%p450_p2)
}
   0xa   :  { %s454_s23 = scalar_lea.vmem %s18_s13, 128  ;;  %p459_p4 = scmp.lt.s32.totalorder %s18_s13, %s18_s13 }
   0xb   :  { %p455_p3 = scmp.ne.s32.totalorder %s18_s13, %s454_s23  ;;  %p460_p5 = scmp.lt.s32.totalorder %s454_s23, %s454_s23 }
   0xd   :  { %p461_p6 = por %p460_p5, %p459_p4 }
   0xf   :  { %p462_p7 = pnand %p461_p6, %p455_p3 }
  0x11   :  { %465 = shalt.err (!%p462_p7)
}
  0x12   :  { %20 = dma.hbm_to_vmem [thread:$0]  %s613_s0, 128, %s18_s13, [#allocation3]  }
  0x13   :  { %s466_s28 = scalar_lea.hbm %s614_s1, 4096 }
  0x14   :  { %p467_p8 = scmp.ne.s32.totalorder %s614_s1, %s466_s28  ;;  %p470_p9 = scmp.lt.u32.totalorder %s466_s28, %s614_s1 }
  0x16   :  { %p472_p10 = pnand %p470_p9, %p467_p8 }
  0x18   :  { %475 = shalt.err (!%p472_p10)
}
  0x19   :  { %s476_s6 = scalar_lea.vmem %s544_s15, 4096  ;;  %p481_p12 = scmp.lt.s32.totalorder %s544_s15, %s544_s15 }
  0x1a   :  { %p477_p11 = scmp.ne.s32.totalorder %s544_s15, %s476_s6  ;;  %p482_p13 = scmp.lt.s32.totalorder %s476_s6, %s476_s6 }
  0x1c   :  { %p483_p0 = por %p482_p13, %p481_p12 }
  0x1e   :  { %p484_p1 = pnand %p483_p0, %p477_p11 }
  0x20   :  { %487 = shalt.err (!%p484_p1)
}
  0x21   :  { %s518_s0 = smov 128   ;;  %s519_s7 = smov 8  }
  0x22   :  { %32 = dma.hbm_to_vmem [thread:$0]  %s614_s1, 4096, %s544_s15, [#allocation6], %s518_s0, %s518_s0, %s519_s7  }
  0x23   :  { %510 = dma.done.wait [#allocation3], 128  }
  0x24   :  { %511 = vsyncadd [#allocation3], 4294967168 }
  0x25   :  { %512 = dma.done.wait [#allocation6], 4096  }
  0x26   :  { %513 = vsyncadd [#allocation6], 4294963200  ;;  %v41_v0 = vld [vmem:[#allocation2] sm:$0xff]  ;;  %v58_v1 = vld [vmem:[#allocation5] sm:$0xff]  ;;  %v520_v4 = vmov 0.0|0.0   ;;  %v42_v11 = vlaneseq  ;;  %vm521_vm1 = vmmov 0  }
  0x27   :  { %44 = vadd.xlane.f32.xlu0 %v41_v0  ;;  %v59_v2 = vld [vmem:[#allocation5 + $0x8] sm:$0xff]  ;;  %v60_v3 = vld [vmem:[#allocation5 + $0x10] sm:$0xff]  ;;  %384 = vmatprep.subr.bf16.mxu0 %v520_v4  ;;  %v61_v6 = vld [vmem:[#allocation5 + $0x18] sm:$0xff]  ;;  %v522_v29 = vmov 0.0   ;;  %s523_s13 = smov [#allocation7]  }
  0x28   :  { %v385_v5 = vpack.c.bf16 %v59_v2, %v58_v1  ;;  %408 = vmatprep.subr.bf16.mxu1 %v520_v4  ;;  %v388_v7 = vpack.c.bf16 %v61_v6, %v60_v3  ;;  %v62_v8 = vld [vmem:[#allocation5 + $0x20] sm:$0xff]  ;;  %v63_v9 = vld [vmem:[#allocation5 + $0x28] sm:$0xff]  ;;  %v580_v12 = vand.u32 127, %v42_v11  ;;  %v64_v18 = vld [vmem:[#allocation5 + $0x30] sm:$0xff]  ;;  %346 = vmatprep.mubr.msk.f32.mxu0 %vm521_vm1, %v522_v29  ;;  %s267_s14 = sshll.u32 %s523_s13, 4  ;;  %s268_s14 = int_to_ptr.vmem [resolvable:$true] %s267_s14 }
  0x29   :  { %v391_v10 = vpack.c.bf16 %v63_v9, %v62_v8  ;;  %v65_v19 = vld [vmem:[#allocation5 + $0x38] sm:$0xff]  ;;  %v66_v21 = vld [vmem:[#allocation5 + $0x40] sm:$0xff]  ;;  %v67_v22 = vld [vmem:[#allocation5 + $0x48] sm:$0xff]  ;;  %381 = vmatprep.mubr.msk.f32.mxu1 %vm521_vm1, %v522_v29  ;;  %s488_s15 = scalar_lea.vmem %s268_s14, 128  ;;  %p493_p3 = scmp.lt.s32.totalorder %s268_s14, %s268_s14 }
  0x2a   :  { %386 = vmatpush3.bf16.msra.mxu0 %v385_v5  ;;  %vm47_vm0 = vcmp.lt.s32.totalorder %v580_v12, 32  ;;  %v394_v20 = vpack.c.bf16 %v65_v19, %v64_v18  ;;  %v397_v23 = vpack.c.bf16 %v67_v22, %v66_v21  ;;  %v68_v24 = vld [vmem:[#allocation5 + $0x50] sm:$0xff]  ;;  %v69_v25 = vld [vmem:[#allocation5 + $0x58] sm:$0xff]  ;;  %v70_v27 = vld [vmem:[#allocation5 + $0x60] sm:$0xff]  ;;  %vm154_vm2 = vcmp.lt.s32.totalorder %v580_v12, 64  ;;  %p489_p2 = scmp.ne.s32.totalorder %s268_s14, %s488_s15  ;;  %p494_p4 = scmp.lt.s32.totalorder %s488_s15, %s488_s15 }
  0x2b   :  { %387 = vmatprep.subr.bf16.mxu0 %v520_v4  ;;  %v400_v26 = vpack.c.bf16 %v69_v25, %v68_v24  ;;  %v71_v28 = vld [vmem:[#allocation5 + $0x68] sm:$0xff]  ;;  %v72_v31 = vld [vmem:[#allocation5 + $0x70] sm:$0xff]  ;;  %v73_v32 = vld [vmem:[#allocation5 + $0x78] sm:$0xff] }
  0x2c   :  { %v403_v30 = vpack.c.bf16 %v71_v28, %v70_v27  ;;  %v406_v33 = vpack.c.bf16 %v73_v32, %v72_v31  ;;  %v277_v40 = vld [vmem:[%s615_s2] ss:$0 sm:$0xff]  ;;  %v166_v44 = vld [vmem:[#allocation5 + $0x80] sm:$0xff]  ;;  %v167_v45 = vld [vmem:[#allocation5 + $0x88] sm:$0xff]  ;;  %p495_p5 = por %p494_p4, %p493_p3 }
  0x2d   :  { %v168_v46 = vld [vmem:[#allocation5 + $0x90] sm:$0xff]  ;;  %v409_v47 = vpack.c.bf16 %v167_v45, %v166_v44  ;;  %v169_v48 = vld [vmem:[#allocation5 + $0x98] sm:$0xff]  ;;  %v170_v50 = vld [vmem:[#allocation5 + $0xa0] sm:$0xff] }
  0x2e   :  { %389 = vmatpush3.bf16.msra.mxu0 %v388_v7  ;;  %v412_v49 = vpack.c.bf16 %v169_v48, %v168_v46  ;;  %v171_v51 = vld [vmem:[#allocation5 + $0xa8] sm:$0xff]  ;;  %v172_v58 = vld [vmem:[#allocation5 + $0xb0] sm:$0xff]  ;;  %v173_v59 = vld [vmem:[#allocation5 + $0xb8] sm:$0xff]  ;;  %p496_p6 = pnand %p495_p5, %p489_p2 }
  0x2f   :  { %390 = vmatprep.subr.bf16.mxu0 %v520_v4  ;;  %410 = vmatpush3.bf16.msra.mxu1 %v409_v47  ;;  %v415_v52 = vpack.c.bf16 %v171_v51, %v170_v50  ;;  %v418_v60 = vpack.c.bf16 %v173_v59, %v172_v58  ;;  %v174_v61 = vld [vmem:[#allocation5 + $0xc0] sm:$0xff]  ;;  %v175_v62 = vld [vmem:[#allocation5 + $0xc8] sm:$0xff]  ;;  %v177_v1 = vld [vmem:[#allocation5 + $0xd8] sm:$0xff] }
  0x30   :  { %411 = vmatprep.subr.bf16.mxu1 %v520_v4  ;;  %v421_v63 = vpack.c.bf16 %v175_v62, %v174_v61  ;;  %v178_v3 = vld [vmem:[#allocation5 + $0xe0] sm:$0xff]  ;;  %v179_v5 = vld [vmem:[#allocation5 + $0xe8] sm:$0xff]  ;;  %v180_v7 = vld [vmem:[#allocation5 + $0xf0] sm:$0xff] }
  0x31   :  { %v427_v6 = vpack.c.bf16 %v179_v5, %v178_v3  ;;  %v181_v8 = vld [vmem:[#allocation5 + $0xf8] sm:$0xff] }
  0x32   :  { %392 = vmatpush3.bf16.msra.mxu0 %v391_v10  ;;  %v430_v9 = vpack.c.bf16 %v181_v8, %v180_v7 }
  0x33   :  { %393 = vmatprep.subr.bf16.mxu0 %v520_v4  ;;  %413 = vmatpush3.bf16.msra.mxu1 %v412_v49 }
  0x34   :  { %414 = vmatprep.subr.bf16.mxu1 %v520_v4 }
  0x36   :  { %395 = vmatpush3.bf16.msra.mxu0 %v394_v20 }
  0x37   :  { %396 = vmatprep.subr.bf16.mxu0 %v520_v4  ;;  %416 = vmatpush3.bf16.msra.mxu1 %v415_v52 }
  0x38   :  { %417 = vmatprep.subr.bf16.mxu1 %v520_v4 }
  0x3a   :  { %398 = vmatpush3.bf16.msra.mxu0 %v397_v23 }
  0x3b   :  { %399 = vmatprep.subr.bf16.mxu0 %v520_v4  ;;  %419 = vmatpush3.bf16.msra.mxu1 %v418_v60 }
  0x3c   :  { %420 = vmatprep.subr.bf16.mxu1 %v520_v4 }
  0x3e   :  { %401 = vmatpush3.bf16.msra.mxu0 %v400_v26 }
  0x3f   :  { %402 = vmatprep.subr.bf16.mxu0 %v520_v4  ;;  %422 = vmatpush3.bf16.msra.mxu1 %v421_v63 }
  0x40   :  { %423 = vmatprep.subr.bf16.mxu1 %v520_v4 }
  0x42   :  { %404 = vmatpush3.bf16.msra.mxu0 %v403_v30 }
  0x43   :  { %405 = vmatprep.subr.bf16.mxu0 %v520_v4 }
  0x46   :  { %407 = vmatpush3.bf16.msra.mxu0 %v406_v33 }
  0xb4   :  { %v45_v13 = vpop.xlane.xlu0 %44 }
  0xb5   :  { %v46_v14 = vmul.f32 0.03125, %v45_v13 }
  0xb7   :  { %v48_v15 = vsub.f32 %v41_v0, %v46_v14  ;;  %v176_v0 = vld [vmem:[#allocation5 + $0xd0] sm:$0xff] }
  0xb8   :  { %v424_v2 = vpack.c.bf16 %v177_v1, %v176_v0 }
  0xb9   :  { %v49_v16 = vsel %vm47_vm0, %v48_v15, 0.0 }
  0xba   :  { %v50_v17 = vmul.f32 %v49_v16, %v49_v16  ;;  %425 = vmatpush3.bf16.msra.mxu1 %v424_v2 }
  0xbb   :  { %426 = vmatprep.subr.bf16.mxu1 %v520_v4 }
  0xbc   :  { %51 = vadd.xlane.f32.xlu0 %v50_v17 }
  0xbe   :  { %428 = vmatpush3.bf16.msra.mxu1 %v427_v6 }
  0xbf   :  { %429 = vmatprep.subr.bf16.mxu1 %v520_v4 }
  0xc2   :  { %431 = vmatpush3.bf16.msra.mxu1 %v430_v9 }
 0x149   :  { %v52_v34 = vpop.xlane.xlu0 %51 }
 0x14a   :  { %v53_v35 = vmul.f32 0.03125, %v52_v34 }
 0x14c   :  { %v54_v36 = vadd.f32 1e-05, %v53_v35 }
 0x14e   :  { %440 = vrsqrt.f32 %v54_v36 }
 0x158   :  { %v441_v37 = vpop.eup %440 }
 0x159   :  { %v56_v38 = vmul.f32 %v441_v37, %v49_v16  ;;  %v279_v16 = vld [vmem:[%s615_s2 + $0x1] ss:$0 sm:$0xff] }
 0x15b   :  { %v57_v39 = vmax.f32 %v56_v38, 0.0 }
 0x15d   :  { %347 = vmatmul.mubr.f32.vlgmr.msra.gmra.mrb[0].mxu0 %v57_v39 }
 0x230   :  { %v147_v41 = vpop.f32.mrb[0].mxu0 }
 0x231   :  { %v148_v42 = vadd.f32 %v277_v40, %v147_v41  ;;  %v348_v43 = vpop.f32.mrb[1].mxu0 }
 0x233   :  { %151 = vadd.xlane.f32.xlu1 %v148_v42 }
 0x2c0   :  { %v152_v53 = vpop.xlane.xlu1 %151 }
 0x2c1   :  { %v153_v54 = vmul.f32 0.015625, %v152_v53 }
 0x2c3   :  { %v155_v55 = vsub.f32 %v148_v42, %v153_v54 }
 0x2c5   :  { %v156_v56 = vsel %vm154_vm2, %v155_v55, 0.0 }
 0x2c6   :  { %v157_v57 = vmul.f32 %v156_v56, %v156_v56 }
 0x2c8   :  { %158 = vadd.xlane.f32.xlu1 %v157_v57 }
 0x355   :  { %v159_v10 = vpop.xlane.xlu1 %158 }
 0x356   :  { %v160_v11 = vmul.f32 0.015625, %v159_v10 }
 0x358   :  { %v161_v12 = vadd.f32 1e-05, %v160_v11 }
 0x35a   :  { %442 = vrsqrt.f32 %v161_v12 }
 0x364   :  { %v443_v13 = vpop.eup %442 }
 0x365   :  { %v163_v14 = vmul.f32 %v443_v13, %v156_v56 }
 0x367   :  { %v164_v15 = vmax.f32 %v163_v14, 0.0 }
 0x369   :  { %382 = vmatmul.mubr.f32.vlgmr.msra.gmra.mrb[0].mxu1 %v164_v15 }
 0x43c   :  { %v256_v17 = vpop.f32.mrb[0].mxu1 }
 0x43d   :  { %v257_v18 = vadd.f32 %v279_v16, %v256_v17  ;;  %v383_v19 = vpop.f32.mrb[1].mxu1 }
 0x43f   :  { %260 = vst [vmem:[#allocation7] sm:$0xff] %v257_v18 }
 0x440   :  { %499 = shalt.err (!%p496_p6)
}
 0x441   :  { %s500_s18 = scalar_lea.hbm %s616_s3, 128 }
 0x442   :  { %p501_p7 = scmp.ne.s32.totalorder %s616_s3, %s500_s18  ;;  %p504_p8 = scmp.lt.u32.totalorder %s500_s18, %s616_s3 }
 0x444   :  { %p506_p9 = pnand %p504_p8, %p501_p7 }
 0x446   :  { %509 = shalt.err (!%p506_p9)
}
 0x447   :  { %270 = dma.vmem_to_hbm [thread:$0]  %s268_s14, 128, %s616_s3, [#allocation4]  }
 0x448   :  { %514 = dma.done.wait [#allocation4], 128  }
 0x449   :  { %515 = vsyncadd [#allocation4], 4294967168 }
 0x44a   :  { %274 = vsyncpa [#allocation3], 1 }
 0x44b   :  { %275 = vsyncpa [#allocation6], 1 }
 0x44c   :  { %276 = vsyncpa [#allocation4], 1 }

// kernel: tpu_custom_call.1
= control target key start
LH: loop header
LB: loop body
LE: loop exit
PB: predicated region body
PF: predicated region fallthrough
CT: control target
= control target key end

     0   :  { %8 = vsyncpa [#allocation3], 0  ;;  %s613_s0 = inlined_call_operand.hbm [shape: f32[8,128], index: 0, kind: input, shape index: {}]   ;;  %s614_s1 = inlined_call_operand.hbm [shape: f32[2,128,128], index: 1, kind: input, shape index: {}]   ;;  %s615_s2 = inlined_call_operand.vmem [shape: f32[2,1,128], index: 2, kind: input, shape index: {}]   ;;  %s616_s3 = inlined_call_operand.hbm [shape: f32[8,128], index: 3, kind: output, shape index: {}]  }
   0x1   :  { %9 = vsyncpa [#allocation6], 0 }
   0x2   :  { %10 = vsyncpa [#allocation4], 0  ;;  %s516_s12 = smov [#allocation2]   ;;  %s517_s14 = smov [#allocation5]  }
   0x3   :  { %s17_s13 = sshll.u32 %s516_s12, 4  ;;  %s26_s15 = sshll.u32 %s517_s14, 4  ;;  %s18_s13 = int_to_ptr.vmem [resolvable:$true] %s17_s13  ;;  %s544_s15 = int_to_ptr.vmem [resolvable:$true] %s26_s15 }
   0x4   :  { %s444_s18 = scalar_lea.hbm %s613_s0, 128 }
   0x5   :  { %p445_p0 = scmp.ne.s32.totalorder %s613_s0, %s444_s18  ;;  %p448_p1 = scmp.lt.u32.totalorder %s444_s18, %s613_s0 }
   0x7   :  { %p450_p2 = pnand %p448_p1, %p445_p0 }
   0x9   :  { %453 = shalt.err (!%p450_p2)
}
   0xa   :  { %s454_s23 = scalar_lea.vmem %s18_s13, 128  ;;  %p459_p4 = scmp.lt.s32.totalorder %s18_s13, %s18_s13 }
   0xb   :  { %p455_p3 = scmp.ne.s32.totalorder %s18_s13, %s454_s23  ;;  %p460_p5 = scmp.lt.s32.totalorder %s454_s23, %s454_s23 }
   0xd   :  { %p461_p6 = por %p460_p5, %p459_p4 }
   0xf   :  { %p462_p7 = pnand %p461_p6, %p455_p3 }
  0x11   :  { %465 = shalt.err (!%p462_p7)
}
  0x12   :  { %20 = dma.hbm_to_vmem [thread:$0]  %s613_s0, 128, %s18_s13, [#allocation3]  }
  0x13   :  { %s466_s28 = scalar_lea.hbm %s614_s1, 4096 }
  0x14   :  { %p467_p8 = scmp.ne.s32.totalorder %s614_s1, %s466_s28  ;;  %p470_p9 = scmp.lt.u32.totalorder %s466_s28, %s614_s1 }
  0x16   :  { %p472_p10 = pnand %p470_p9, %p467_p8 }
  0x18   :  { %475 = shalt.err (!%p472_p10)
}
  0x19   :  { %s476_s6 = scalar_lea.vmem %s544_s15, 4096  ;;  %p481_p12 = scmp.lt.s32.totalorder %s544_s15, %s544_s15 }
  0x1a   :  { %p477_p11 = scmp.ne.s32.totalorder %s544_s15, %s476_s6  ;;  %p482_p13 = scmp.lt.s32.totalorder %s476_s6, %s476_s6 }
  0x1c   :  { %p483_p0 = por %p482_p13, %p481_p12 }
  0x1e   :  { %p484_p1 = pnand %p483_p0, %p477_p11 }
  0x20   :  { %487 = shalt.err (!%p484_p1)
}
  0x21   :  { %s518_s0 = smov 128   ;;  %s519_s7 = smov 8  }
  0x22   :  { %32 = dma.hbm_to_vmem [thread:$0]  %s614_s1, 4096, %s544_s15, [#allocation6], %s518_s0, %s518_s0, %s519_s7  }
  0x23   :  { %510 = dma.done.wait [#allocation3], 128  }
  0x24   :  { %511 = vsyncadd [#allocation3], 4294967168 }
  0x25   :  { %512 = dma.done.wait [#allocation6], 4096  }
  0x26   :  { %513 = vsyncadd [#allocation6], 4294963200  ;;  %v41_v0 = vld [vmem:[#allocation2] sm:$0xff]  ;;  %v58_v1 = vld [vmem:[#allocation5] sm:$0xff]  ;;  %v520_v4 = vmov 0.0|0.0   ;;  %v42_v11 = vlaneseq  ;;  %vm521_vm1 = vmmov 0  }
  0x27   :  { %44 = vadd.xlane.f32.xlu0 %v41_v0  ;;  %v59_v2 = vld [vmem:[#allocation5 + $0x8] sm:$0xff]  ;;  %v60_v3 = vld [vmem:[#allocation5 + $0x10] sm:$0xff]  ;;  %384 = vmatprep.subr.bf16.mxu0 %v520_v4  ;;  %v61_v6 = vld [vmem:[#allocation5 + $0x18] sm:$0xff]  ;;  %v522_v29 = vmov 0.0   ;;  %s523_s13 = smov [#allocation7]  }
  0x28   :  { %v385_v5 = vpack.c.bf16 %v59_v2, %v58_v1  ;;  %408 = vmatprep.subr.bf16.mxu1 %v520_v4  ;;  %v388_v7 = vpack.c.bf16 %v61_v6, %v60_v3  ;;  %v62_v8 = vld [vmem:[#allocation5 + $0x20] sm:$0xff]  ;;  %v63_v9 = vld [vmem:[#allocation5 + $0x28] sm:$0xff]  ;;  %v580_v12 = vand.u32 127, %v42_v11  ;;  %v64_v18 = vld [vmem:[#allocation5 + $0x30] sm:$0xff]  ;;  %346 = vmatprep.mubr.msk.f32.mxu0 %vm521_vm1, %v522_v29  ;;  %s267_s14 = sshll.u32 %s523_s13, 4  ;;  %s268_s14 = int_to_ptr.vmem [resolvable:$true] %s267_s14 }
  0x29   :  { %v391_v10 = vpack.c.bf16 %v63_v9, %v62_v8  ;;  %v65_v19 = vld [vmem:[#allocation5 + $0x38] sm:$0xff]  ;;  %v66_v21 = vld [vmem:[#allocation5 + $0x40] sm:$0xff]  ;;  %v67_v22 = vld [vmem:[#allocation5 + $0x48] sm:$0xff]  ;;  %381 = vmatprep.mubr.msk.f32.mxu1 %vm521_vm1, %v522_v29  ;;  %s488_s15 = scalar_lea.vmem %s268_s14, 128  ;;  %p493_p3 = scmp.lt.s32.totalorder %s268_s14, %s268_s14 }
  0x2a   :  { %386 = vmatpush3.bf16.msra.mxu0 %v385_v5  ;;  %vm47_vm0 = vcmp.lt.s32.totalorder %v580_v12, 32  ;;  %v394_v20 = vpack.c.bf16 %v65_v19, %v64_v18  ;;  %v397_v23 = vpack.c.bf16 %v67_v22, %v66_v21  ;;  %v68_v24 = vld [vmem:[#allocation5 + $0x50] sm:$0xff]  ;;  %v69_v25 = vld [vmem:[#allocation5 + $0x58] sm:$0xff]  ;;  %v70_v27 = vld [vmem:[#allocation5 + $0x60] sm:$0xff]  ;;  %vm154_vm2 = vcmp.lt.s32.totalorder %v580_v12, 64  ;;  %p489_p2 = scmp.ne.s32.totalorder %s268_s14, %s488_s15  ;;  %p494_p4 = scmp.lt.s32.totalorder %s488_s15, %s488_s15 }
  0x2b   :  { %387 = vmatprep.subr.bf16.mxu0 %v520_v4  ;;  %v400_v26 = vpack.c.bf16 %v69_v25, %v68_v24  ;;  %v71_v28 = vld [vmem:[#allocation5 + $0x68] sm:$0xff]  ;;  %v72_v31 = vld [vmem:[#allocation5 + $0x70] sm:$0xff]  ;;  %v73_v32 = vld [vmem:[#allocation5 + $0x78] sm:$0xff] }
  0x2c   :  { %v403_v30 = vpack.c.bf16 %v71_v28, %v70_v27  ;;  %v406_v33 = vpack.c.bf16 %v73_v32, %v72_v31  ;;  %v277_v40 = vld [vmem:[%s615_s2] ss:$0 sm:$0xff]  ;;  %v166_v44 = vld [vmem:[#allocation5 + $0x80] sm:$0xff]  ;;  %v167_v45 = vld [vmem:[#allocation5 + $0x88] sm:$0xff]  ;;  %p495_p5 = por %p494_p4, %p493_p3 }
  0x2d   :  { %v168_v46 = vld [vmem:[#allocation5 + $0x90] sm:$0xff]  ;;  %v409_v47 = vpack.c.bf16 %v167_v45, %v166_v44  ;;  %v169_v48 = vld [vmem:[#allocation5 + $0x98] sm:$0xff]  ;;  %v170_v50 = vld [vmem:[#allocation5 + $0xa0] sm:$0xff] }
  0x2e   :  { %389 = vmatpush3.bf16.msra.mxu0 %v388_v7  ;;  %v412_v49 = vpack.c.bf16 %v169_v48, %v168_v46  ;;  %v171_v51 = vld [vmem:[#allocation5 + $0xa8] sm:$0xff]  ;;  %v172_v58 = vld [vmem:[#allocation5 + $0xb0] sm:$0xff]  ;;  %v173_v59 = vld [vmem:[#allocation5 + $0xb8] sm:$0xff]  ;;  %p496_p6 = pnand %p495_p5, %p489_p2 }
  0x2f   :  { %390 = vmatprep.subr.bf16.mxu0 %v520_v4  ;;  %410 = vmatpush3.bf16.msra.mxu1 %v409_v47  ;;  %v415_v52 = vpack.c.bf16 %v171_v51, %v170_v50  ;;  %v418_v60 = vpack.c.bf16 %v173_v59, %v172_v58  ;;  %v174_v61 = vld [vmem:[#allocation5 + $0xc0] sm:$0xff]  ;;  %v175_v62 = vld [vmem:[#allocation5 + $0xc8] sm:$0xff]  ;;  %v177_v1 = vld [vmem:[#allocation5 + $0xd8] sm:$0xff] }
  0x30   :  { %411 = vmatprep.subr.bf16.mxu1 %v520_v4  ;;  %v421_v63 = vpack.c.bf16 %v175_v62, %v174_v61  ;;  %v178_v3 = vld [vmem:[#allocation5 + $0xe0] sm:$0xff]  ;;  %v179_v5 = vld [vmem:[#allocation5 + $0xe8] sm:$0xff]  ;;  %v180_v7 = vld [vmem:[#allocation5 + $0xf0] sm:$0xff] }
  0x31   :  { %v427_v6 = vpack.c.bf16 %v179_v5, %v178_v3  ;;  %v181_v8 = vld [vmem:[#allocation5 + $0xf8] sm:$0xff] }
  0x32   :  { %392 = vmatpush3.bf16.msra.mxu0 %v391_v10  ;;  %v430_v9 = vpack.c.bf16 %v181_v8, %v180_v7 }
  0x33   :  { %393 = vmatprep.subr.bf16.mxu0 %v520_v4  ;;  %413 = vmatpush3.bf16.msra.mxu1 %v412_v49 }
  0x34   :  { %414 = vmatprep.subr.bf16.mxu1 %v520_v4 }
  0x36   :  { %395 = vmatpush3.bf16.msra.mxu0 %v394_v20 }
  0x37   :  { %396 = vmatprep.subr.bf16.mxu0 %v520_v4  ;;  %416 = vmatpush3.bf16.msra.mxu1 %v415_v52 }
  0x38   :  { %417 = vmatprep.subr.bf16.mxu1 %v520_v4 }
  0x3a   :  { %398 = vmatpush3.bf16.msra.mxu0 %v397_v23 }
  0x3b   :  { %399 = vmatprep.subr.bf16.mxu0 %v520_v4  ;;  %419 = vmatpush3.bf16.msra.mxu1 %v418_v60 }
  0x3c   :  { %420 = vmatprep.subr.bf16.mxu1 %v520_v4 }
  0x3e   :  { %401 = vmatpush3.bf16.msra.mxu0 %v400_v26 }
  0x3f   :  { %402 = vmatprep.subr.bf16.mxu0 %v520_v4  ;;  %422 = vmatpush3.bf16.msra.mxu1 %v421_v63 }
  0x40   :  { %423 = vmatprep.subr.bf16.mxu1 %v520_v4 }
  0x42   :  { %404 = vmatpush3.bf16.msra.mxu0 %v403_v30 }
  0x43   :  { %405 = vmatprep.subr.bf16.mxu0 %v520_v4 }
  0x46   :  { %407 = vmatpush3.bf16.msra.mxu0 %v406_v33 }
  0xb4   :  { %v45_v13 = vpop.xlane.xlu0 %44 }
  0xb5   :  { %v46_v14 = vmul.f32 0.03125, %v45_v13 }
  0xb7   :  { %v48_v15 = vsub.f32 %v41_v0, %v46_v14  ;;  %v176_v0 = vld [vmem:[#allocation5 + $0xd0] sm:$0xff] }
  0xb8   :  { %v424_v2 = vpack.c.bf16 %v177_v1, %v176_v0 }
  0xb9   :  { %v49_v16 = vsel %vm47_vm0, %v48_v15, 0.0 }
  0xba   :  { %v50_v17 = vmul.f32 %v49_v16, %v49_v16  ;;  %425 = vmatpush3.bf16.msra.mxu1 %v424_v2 }
  0xbb   :  { %426 = vmatprep.subr.bf16.mxu1 %v520_v4 }
  0xbc   :  { %51 = vadd.xlane.f32.xlu0 %v50_v17 }
  0xbe   :  { %428 = vmatpush3.bf16.msra.mxu1 %v427_v6 }
  0xbf   :  { %429 = vmatprep.subr.bf16.mxu1 %v520_v4 }
  0xc2   :  { %431 = vmatpush3.bf16.msra.mxu1 %v430_v9 }
 0x149   :  { %v52_v34 = vpop.xlane.xlu0 %51 }
 0x14a   :  { %v53_v35 = vmul.f32 0.03125, %v52_v34 }
 0x14c   :  { %v54_v36 = vadd.f32 1e-05, %v53_v35 }
 0x14e   :  { %440 = vrsqrt.f32 %v54_v36 }
 0x158   :  { %v441_v37 = vpop.eup %440 }
 0x159   :  { %v56_v38 = vmul.f32 %v441_v37, %v49_v16  ;;  %v279_v16 = vld [vmem:[%s615_s2 + $0x1] ss:$0 sm:$0xff] }
 0x15b   :  { %v57_v39 = vmax.f32 %v56_v38, 0.0 }
 0x15d   :  { %347 = vmatmul.mubr.f32.vlgmr.msra.gmra.mrb[0].mxu0 %v57_v39 }
 0x230   :  { %v147_v41 = vpop.f32.mrb[0].mxu0 }
 0x231   :  { %v148_v42 = vadd.f32 %v277_v40, %v147_v41  ;;  %v348_v43 = vpop.f32.mrb[1].mxu0 }
 0x233   :  { %151 = vadd.xlane.f32.xlu1 %v148_v42 }
 0x2c0   :  { %v152_v53 = vpop.xlane.xlu1 %151 }
 0x2c1   :  { %v153_v54 = vmul.f32 0.015625, %v152_v53 }
 0x2c3   :  { %v155_v55 = vsub.f32 %v148_v42, %v153_v54 }
 0x2c5   :  { %v156_v56 = vsel %vm154_vm2, %v155_v55, 0.0 }
 0x2c6   :  { %v157_v57 = vmul.f32 %v156_v56, %v156_v56 }
 0x2c8   :  { %158 = vadd.xlane.f32.xlu1 %v157_v57 }
 0x355   :  { %v159_v10 = vpop.xlane.xlu1 %158 }
 0x356   :  { %v160_v11 = vmul.f32 0.015625, %v159_v10 }
 0x358   :  { %v161_v12 = vadd.f32 1e-05, %v160_v11 }
 0x35a   :  { %442 = vrsqrt.f32 %v161_v12 }
 0x364   :  { %v443_v13 = vpop.eup %442 }
 0x365   :  { %v163_v14 = vmul.f32 %v443_v13, %v156_v56 }
 0x367   :  { %v164_v15 = vmax.f32 %v163_v14, 0.0 }
 0x369   :  { %382 = vmatmul.mubr.f32.vlgmr.msra.gmra.mrb[0].mxu1 %v164_v15 }
 0x43c   :  { %v256_v17 = vpop.f32.mrb[0].mxu1 }
 0x43d   :  { %v257_v18 = vadd.f32 %v279_v16, %v256_v17  ;;  %v383_v19 = vpop.f32.mrb[1].mxu1 }
 0x43f   :  { %260 = vst [vmem:[#allocation7] sm:$0xff] %v257_v18 }
 0x440   :  { %499 = shalt.err (!%p496_p6)
}
 0x441   :  { %s500_s18 = scalar_lea.hbm %s616_s3, 128 }
 0x442   :  { %p501_p7 = scmp.ne.s32.totalorder %s616_s3, %s500_s18  ;;  %p504_p8 = scmp.lt.u32.totalorder %s500_s18, %s616_s3 }
 0x444   :  { %p506_p9 = pnand %p504_p8, %p501_p7 }
 0x446   :  { %509 = shalt.err (!%p506_p9)
}
 0x447   :  { %270 = dma.vmem_to_hbm [thread:$0]  %s268_s14, 128, %s616_s3, [#allocation4]  }
 0x448   :  { %514 = dma.done.wait [#allocation4], 128  }
 0x449   :  { %515 = vsyncadd [#allocation4], 4294967168 }
 0x44a   :  { %274 = vsyncpa [#allocation3], 1 }
 0x44b   :  { %275 = vsyncpa [#allocation6], 1 }
 0x44c   :  { %276 = vsyncpa [#allocation4], 1 }

</bundles_post_ra>
